<compile_context>
chip_gen: v5e
topology: v5e:2x2
jax: 0.10.0
libtpu: 0.0.40
codegen_flags: <defaults>
</compile_context>

<pallas_src>
import functools

import numpy as np
import jax
import jax.numpy as jnp
from jax.experimental import pallas as pl
from jax.experimental.pallas import tpu as pltpu


# ---------------------------------------------------------------------------
# Pallas kernel: identity / pass-through copy of one VMEM tile
# ---------------------------------------------------------------------------
def _identity_kernel(x_ref, o_ref):
    o_ref[...] = x_ref[...]


_MIB = 1024 * 1024
_LANE_CAP = 4096                    # max lane width (multiple of 128)


def _sublane_min(dtype) -> int:
    """Minimum sublane tile for the dtype (f32: 8, bf16: 16, int8/fp8: 32)."""
    return {4: 8, 2: 16, 1: 32}.get(jnp.dtype(dtype).itemsize, 8)


@functools.lru_cache(maxsize=1)
def _chip_budget():
    """(target_block_bytes, vmem_limit_bytes), derived from the chip's VMEM."""
    try:
        vmem_cap = int(pltpu.get_tpu_info().vmem_capacity_bytes)
    except Exception:
        vmem_cap = 64 * _MIB            # conservative fallback (v7x per-TC)
    if vmem_cap >= 96 * _MIB:
        # v5e / v6e: 128 MiB physical VMEM -> coarse blocks, generous limit.
        block_bytes = 6 * _MIB
        vmem_limit = 64 * _MIB
    else:
        # v7x: 64 MiB physical VMEM per TC -> 4 MiB blocks, derived limit:
        # 2 buffers x (in + out) x block + headroom, kept well under physical.
        block_bytes = 4 * _MIB
        vmem_limit = min(48 * _MIB, 4 * block_bytes + 16 * _MIB)
    return block_bytes, vmem_limit


def _params_and_cost(nbytes: int):
    _, vmem_limit = _chip_budget()
    params = pltpu.CompilerParams(
        # NOTE: if an xprof trace on v7x shows one TensorCore idle, switch
        # this axis to pltpu.CORE_PARALLEL (grid is kept >= 2 steps below).
        dimension_semantics=("parallel",),
        vmem_limit_bytes=vmem_limit,
    )
    cost = pl.CostEstimate(flops=0, transcendentals=0,
                           bytes_accessed=2 * nbytes)
    return params, cost


def _pallas_copy_2d(x2: jax.Array, block_rows: int) -> jax.Array:
    """Copy a lane-dense 2-D slab through a Pallas kernel, tiled along rows."""
    rows, cols = x2.shape
    nbytes = int(x2.size) * int(jnp.dtype(x2.dtype).itemsize)
    params, cost = _params_and_cost(nbytes)
    return pl.pallas_call(
        _identity_kernel,
        out_shape=jax.ShapeDtypeStruct((rows, cols), x2.dtype),
        grid=(pl.cdiv(rows, block_rows),),
        in_specs=[pl.BlockSpec((block_rows, cols), lambda i: (i, 0))],
        out_specs=pl.BlockSpec((block_rows, cols), lambda i: (i, 0)),
        compiler_params=params,
        cost_estimate=cost,
    )(x2)


def _pallas_copy_1d(flat: jax.Array, chunk: int) -> jax.Array:
    """Copy a flat 1-D array; Pallas masks the partial final block."""
    total = flat.shape[0]
    nbytes = int(flat.size) * int(jnp.dtype(flat.dtype).itemsize)
    params, cost = _params_and_cost(nbytes)
    return pl.pallas_call(
        _identity_kernel,
        out_shape=jax.ShapeDtypeStruct((total,), flat.dtype),
        grid=(pl.cdiv(total, chunk),),
        in_specs=[pl.BlockSpec((chunk,), lambda i: (i,))],
        out_specs=pl.BlockSpec((chunk,), lambda i: (i,)),
        compiler_params=params,
        cost_estimate=cost,
    )(flat)


def identity_noise_pallas(x: jax.Array) -> jax.Array:
    """Identity noise layer: copies x through a Pallas TPU kernel.

    Aligned totals go through a lane-dense (rows, L) slab with multi-MiB,
    generation-aware blocks; ragged totals go through a single 1-D call with
    a masked final block (no slices, no concatenate, no padding).
    """
    orig_shape = x.shape
    total = int(x.size)
    if total == 0:
        return x

    flat = x.reshape(-1)
    itemsize = int(jnp.dtype(x.dtype).itemsize)
    sub_min = _sublane_min(x.dtype)
    block_bytes, _ = _chip_budget()

    if total % 128 == 0:
        # Pick the widest lane width L (multiple of 128, <= _LANE_CAP) that
        # divides the element count; prefer one leaving >= sub_min rows so the
        # slab is fully (sublane, lane)-dense.
        cap = min(total, _LANE_CAP)
        best_any, best_tall = 0, 0
        for cand in range(128, cap + 1, 128):
            if total % cand == 0:
                best_any = cand
                if total // cand >= sub_min:
                    best_tall = cand
        L = best_tall or best_any
        rows = total // L

        # Rows per block from the per-generation byte target ...
        block_rows = max(sub_min,
                         (block_bytes // (L * itemsize)) // sub_min * sub_min)
        # ... capped so the grid keeps >= 2 steps whenever possible, so both
        # v7x TensorCores get work instead of one serving a 1-step grid.
        if rows >= 2 * sub_min:
            half = ((rows + 1) // 2 + sub_min - 1) // sub_min * sub_min
            block_rows = min(block_rows, half)
        block_rows = min(block_rows, rows)

        out_flat = _pallas_copy_2d(flat.reshape(rows, L), block_rows).reshape(-1)
    else:
        # Ragged total (not a multiple of 128): one 1-D pallas_call, Pallas
        # masks the partial final block.  No slice/concat extra HBM passes.
        if total <= 128:
            chunk = total                           # full-array-dim exemption
        else:
            target_elems = max(128, (block_bytes // itemsize) // 128 * 128)
            chunk = min(target_elems, (total // 128) * 128)
        out_flat = _pallas_copy_1d(flat, chunk)

    return out_flat.reshape(orig_shape)


# Trace/compile once per (shape, dtype): the host-side lane/block search and
# pallas_call construction do not rerun on every forward().
_identity_noise_jit = jax.jit(identity_noise_pallas)


# ---------------------------------------------------------------------------
# Noise layers (JAX side)
# ---------------------------------------------------------------------------
class Identity:
    """Identity noise layer: returns encoded_and_cover unchanged, routing the
    encoded image through the Pallas copy kernel."""

    def __call__(self, encoded_and_cover):
        encoded, cover = encoded_and_cover
        noised = _identity_noise_jit(encoded)
        return [noised, cover]


class Noiser:
    """Combines noise layers; forward picks one at random and applies it."""

    def __init__(self, noise_layers: list, device=None, seed: int = 0):
        self.noise_layers = [Identity()]
        for layer in noise_layers:
            self.noise_layers.append(layer)
        # Deterministic host-side RNG stand-in for np.random.choice.
        # TODO(synk): host RNG layer selection is not jittable/traceable, same
        # as the PyTorch reference (Python-level dispatch per call).
        self._rng = np.random.RandomState(seed)

    def __call__(self, encoded_and_cover):
        random_noise_layer = self._rng.choice(self.noise_layers, 1)[0]
        return random_noise_layer(encoded_and_cover)

    # match nn.Module.forward naming
    forward = __call__


# ---------------------------------------------------------------------------
# Demo / self-test
# ---------------------------------------------------------------------------
if __name__ == "__main__":
    key = jax.random.PRNGKey(0)
    k_enc, k_cov = jax.random.split(key)

    # NCHW: batch=2, channels=4, spatial=16x16
    encoded = jax.random.normal(k_enc, (2, 4, 16, 16), dtype=jnp.float32)
    cover = jax.random.normal(k_cov, (2, 4, 16, 16), dtype=jnp.float32)

    # No extra noise layers supplied -> only Identity is available.
    # TODO(synk): additional HiDDeN noise layers (Crop/Dropout/Jpeg) are not
    # part of this module's __init__ body, so none are synthesized.
    noiser = Noiser(noise_layers=[], device=None)

    noised_and_cover = noiser([encoded, cover])
    noised, cover_out = noised_and_cover

    noised = jax.block_until_ready(noised)
    cover_out = jax.block_until_ready(cover_out)

    assert noised.shape == encoded.shape and noised.dtype == encoded.dtype
    assert bool(jnp.allclose(noised, encoded)), "Identity noise must be exact"
    assert bool(jnp.allclose(cover_out, cover)), "Cover image must pass through"

    # Exercise the ragged-total (non-multiple-of-128) single-call path too.
    ragged = jax.random.normal(key, (3, 5, 7), dtype=jnp.float32)   # 105 elems
    ragged_out = jax.block_until_ready(_identity_noise_jit(ragged))
    assert bool(jnp.allclose(ragged_out, ragged)), "Ragged identity must be exact"

    print("KERNEL_OK")
</pallas_src>

<mosaic_0001>
module attributes {stable_mosaic.version = 11 : i64} {
  func.func @_identity_kernel(%arg0: i32, %arg1: memref<8x256xf32, #tpu.memory_space<vmem>>, %arg2: memref<8x256xf32, #tpu.memory_space<vmem>>) attributes {dimension_semantics = [#tpu.dimension_semantics<parallel>], iteration_bounds = array<i64: 1>, scalar_prefetch = 0 : i64, scratch_operands = 0 : i64, tpu.core_type = #tpu.core_type<tc>, window_params = [{transform_indices = @transform_0, window_bounds = array<i64: 8, 256>}, {transform_indices = @transform_1, window_bounds = array<i64: 8, 256>}]} {
    %c0 = arith.constant 0 : index
    %c0_0 = arith.constant 0 : index
    %0 = vector.load %arg1[%c0, %c0_0] : memref<8x256xf32, #tpu.memory_space<vmem>>, vector<8x256xf32>
    %c0_1 = arith.constant 0 : index
    %c0_2 = arith.constant 0 : index
    %1 = vector.load %arg2[%c0_1, %c0_2] : memref<8x256xf32, #tpu.memory_space<vmem>>, vector<8x256xf32>
    tpu.vector_store %arg2[%c0_1, %c0_2], %0 {strides = array<i32>} : memref<8x256xf32, #tpu.memory_space<vmem>>, vector<8x256xf32>,
    return
  }
  func.func @transform_0(%arg0: i32) -> (i32, i32) {
    %c0_i32 = arith.constant 0 : i32
    %c0_i32_0 = arith.constant 0 : i32
    return %arg0, %c0_i32 : i32, i32
  }
  func.func @transform_1(%arg0: i32) -> (i32, i32) {
    %c0_i32 = arith.constant 0 : i32
    %c0_i32_0 = arith.constant 0 : i32
    return %arg0, %c0_i32 : i32, i32
  }
}

</mosaic_0001>

<bundles_post_ra>
// kernel: identity_noise_pallas.1
= control target key start
LH: loop header
LB: loop body
LE: loop exit
PB: predicated region body
PF: predicated region fallthrough
CT: control target
= control target key end

     0   :  { %s38_s0 = inlined_call_operand.vmem [shape: f32[8,256], index: 0, kind: input, shape index: {}]   ;;  %s39_s1 = inlined_call_operand.vmem [shape: f32[8,256], index: 1, kind: output, shape index: {}]  }
   0x1   :  { %v8_v0 = vld [vmem:[%s38_s0] sm:$0xff]  ;;  %v9_v1 = vld [vmem:[%s38_s0 + $0x8] sm:$0xff] }
   0x2   :  { %10 = vst [vmem:[%s39_s1] sm:$0xff] %v8_v0 }
   0x3   :  { %11 = vst [vmem:[%s39_s1 + $0x8] sm:$0xff] %v9_v1 }

</bundles_post_ra>
